<compile_context>
chip_gen: v5e
topology: v5e:2x2
jax: 0.10.0
libtpu: 0.0.40
codegen_flags: <defaults>
</compile_context>

<pallas_src>
import functools

import jax
import jax.numpy as jnp
from jax.experimental import pallas as pl
from jax.experimental.pallas import tpu as pltpu

_WIDTH = 512            # lane-dense last dim (multiple of 128)
_BLOCK_ROWS = 512       # rows per grid step -> 512*512*4B = 1 MiB f32 per input tile
_EPS = 1e-6


def _dice_kernel(x_ref, y_ref, out_ref, num_acc, den_acc, *, hard, eps):
    # x_ref/y_ref: (block_rows, width) tiles in VMEM (native dtype)
    # out_ref:     (1, 1) f32 in SMEM (final dice coefficient)
    # num_acc/den_acc: (block_rows, width) f32 VMEM accumulators
    i = pl.program_id(0)

    @pl.when(i == 0)
    def _():
        num_acc[...] = jnp.zeros_like(num_acc)
        den_acc[...] = jnp.zeros_like(den_acc)

    xf = x_ref[...].astype(jnp.float32)
    yf = y_ref[...].astype(jnp.float32)
    if hard:
        xf = jnp.where(xf >= 0.5, 1.0, 0.0).astype(jnp.float32)
        yf = jnp.where(yf >= 0.5, 1.0, 0.0).astype(jnp.float32)

    # Pure-VPU elementwise accumulation; zero padding contributes nothing
    # to either the numerator or the denominator.
    num_acc[...] += xf * yf
    den_acc[...] += xf + yf

    @pl.when(i == pl.num_programs(0) - 1)
    def _():
        num = jnp.sum(num_acc[...])
        den = jnp.sum(den_acc[...])
        out_ref[0, 0] = (2.0 * num + eps) / (den + eps)


def dice(x, y, *, hard=False, eps=_EPS, block_rows=_BLOCK_ROWS, width=_WIDTH):
    """Global (soft or hard) Dice coefficient between two tensors via Pallas."""
    assert x.shape == y.shape, "input shape mismatch"
    n = x.size

    # Shrink the block for tiny inputs so we don't pad up to a full 1 MiB tile.
    rows_needed = -(-n // width)
    block_rows = min(block_rows, ((rows_needed + 7) // 8) * 8)
    rows = -(-rows_needed // block_rows) * block_rows
    padded = rows * width
    pad = padded - n

    # Single fused pad + reshape, in the native dtype (no wrapper up-cast).
    xf = x.reshape(-1)
    yf = y.reshape(-1)
    if pad:
        xf = jnp.pad(xf, (0, pad))
        yf = jnp.pad(yf, (0, pad))
    x2d = xf.reshape(rows, width)
    y2d = yf.reshape(rows, width)

    grid = (rows // block_rows,)
    kernel = functools.partial(_dice_kernel, hard=hard, eps=float(eps))

    out = pl.pallas_call(
        kernel,
        out_shape=jax.ShapeDtypeStruct((1, 1), jnp.float32),
        grid_spec=pltpu.PrefetchScalarGridSpec(
            num_scalar_prefetch=0,
            grid=grid,
            in_specs=[
                pl.BlockSpec((block_rows, width), lambda i: (i, 0)),
                pl.BlockSpec((block_rows, width), lambda i: (i, 0)),
            ],
            out_specs=pl.BlockSpec(
                (1, 1), lambda i: (0, 0), memory_space=pltpu.SMEM
            ),
            scratch_shapes=[
                pltpu.VMEM((block_rows, width), jnp.float32),
                pltpu.VMEM((block_rows, width), jnp.float32),
            ],
        ),
        compiler_params=pltpu.CompilerParams(
            dimension_semantics=("arbitrary",)
        ),
    )(x2d, y2d)

    return out[0, 0]


if __name__ == "__main__":
    key = jax.random.PRNGKey(0)
    k1, k2 = jax.random.split(key)

    # Small NCHW-shaped probability maps (batch=2, channels=4, spatial=16x16).
    x = jax.random.uniform(k1, (2, 4, 16, 16), dtype=jnp.float32)
    y = jax.random.uniform(k2, (2, 4, 16, 16), dtype=jnp.float32)

    soft = jax.block_until_ready(dice(x, y))
    hard = jax.block_until_ready(dice(x, y, hard=True))

    # Pure-JAX references with identical semantics.
    ref_soft = (2.0 * jnp.sum(x * y) + _EPS) / (jnp.sum(x) + jnp.sum(y) + _EPS)
    xh = (x >= 0.5).astype(jnp.float32)
    yh = (y >= 0.5).astype(jnp.float32)
    ref_hard = (2.0 * jnp.sum(xh * yh) + _EPS) / (jnp.sum(xh) + jnp.sum(yh) + _EPS)

    assert jnp.allclose(soft, ref_soft, rtol=1e-5, atol=1e-6), (soft, ref_soft)
    assert jnp.allclose(hard, ref_hard, rtol=1e-5, atol=1e-6), (hard, ref_hard)

    print("KERNEL_OK")
</pallas_src>

<mosaic_0001>
module attributes {stable_mosaic.version = 11 : i64} {
  func.func @_dice_kernel(%arg0: i32, %arg1: memref<8x512xf32, #tpu.memory_space<vmem>>, %arg2: memref<8x512xf32, #tpu.memory_space<vmem>>, %arg3: memref<1x1xf32, #tpu.memory_space<smem>>, %arg4: memref<8x512xf32, #tpu.memory_space<vmem>>, %arg5: memref<8x512xf32, #tpu.memory_space<vmem>>) attributes {dimension_semantics = [#tpu.dimension_semantics<arbitrary>], iteration_bounds = array<i64: 1>, scalar_prefetch = 0 : i64, scratch_operands = 2 : i64, tpu.core_type = #tpu.core_type<tc>, window_params = [{transform_indices = @transform_0, window_bounds = array<i64: 8, 512>}, {transform_indices = @transform_1, window_bounds = array<i64: 8, 512>}, {transform_indices = @transform_2, window_bounds = array<i64: 1, 1>}]} {
    %c0_i32 = arith.constant 0 : i32
    %0 = arith.cmpi eq, %arg0, %c0_i32 : i32
    %1 = arith.extui %0 : i1 to i32
    %c0_i32_0 = arith.constant 0 : i32
    %2 = arith.cmpi ne, %1, %c0_i32_0 : i32
    scf.if %2 {
      %cst = arith.constant 0.000000e+00 : f32
      %16 = vector.broadcast %cst : f32 to vector<8x512xf32>
      %c0_14 = arith.constant 0 : index
      %c0_15 = arith.constant 0 : index
      %17 = vector.load %arg4[%c0_14, %c0_15] : memref<8x512xf32, #tpu.memory_space<vmem>>, vector<8x512xf32>
      tpu.vector_store %arg4[%c0_14, %c0_15], %16 {strides = array<i32>} : memref<8x512xf32, #tpu.memory_space<vmem>>, vector<8x512xf32>,
      %cst_16 = arith.constant 0.000000e+00 : f32
      %18 = vector.broadcast %cst_16 : f32 to vector<8x512xf32>
      %c0_17 = arith.constant 0 : index
      %c0_18 = arith.constant 0 : index
      %19 = vector.load %arg5[%c0_17, %c0_18] : memref<8x512xf32, #tpu.memory_space<vmem>>, vector<8x512xf32>
      tpu.vector_store %arg5[%c0_17, %c0_18], %18 {strides = array<i32>} : memref<8x512xf32, #tpu.memory_space<vmem>>, vector<8x512xf32>,
    } else {
    }
    %c0 = arith.constant 0 : index
    %c0_1 = arith.constant 0 : index
    %3 = vector.load %arg1[%c0, %c0_1] : memref<8x512xf32, #tpu.memory_space<vmem>>, vector<8x512xf32>
    %c0_2 = arith.constant 0 : index
    %c0_3 = arith.constant 0 : index
    %4 = vector.load %arg2[%c0_2, %c0_3] : memref<8x512xf32, #tpu.memory_space<vmem>>, vector<8x512xf32>
    %c0_4 = arith.constant 0 : index
    %c0_5 = arith.constant 0 : index
    %5 = vector.load %arg4[%c0_4, %c0_5] : memref<8x512xf32, #tpu.memory_space<vmem>>, vector<8x512xf32>
    %6 = arith.mulf %3, %4 : vector<8x512xf32>
    %7 = arith.addf %5, %6 : vector<8x512xf32>
    %c0_6 = arith.constant 0 : index
    %c0_7 = arith.constant 0 : index
    %8 = vector.load %arg4[%c0_6, %c0_7] : memref<8x512xf32, #tpu.memory_space<vmem>>, vector<8x512xf32>
    tpu.vector_store %arg4[%c0_6, %c0_7], %7 {strides = array<i32>} : memref<8x512xf32, #tpu.memory_space<vmem>>, vector<8x512xf32>,
    %c0_8 = arith.constant 0 : index
    %c0_9 = arith.constant 0 : index
    %9 = vector.load %arg5[%c0_8, %c0_9] : memref<8x512xf32, #tpu.memory_space<vmem>>, vector<8x512xf32>
    %10 = arith.addf %3, %4 : vector<8x512xf32>
    %11 = arith.addf %9, %10 : vector<8x512xf32>
    %c0_10 = arith.constant 0 : index
    %c0_11 = arith.constant 0 : index
    %12 = vector.load %arg5[%c0_10, %c0_11] : memref<8x512xf32, #tpu.memory_space<vmem>>, vector<8x512xf32>
    tpu.vector_store %arg5[%c0_10, %c0_11], %11 {strides = array<i32>} : memref<8x512xf32, #tpu.memory_space<vmem>>, vector<8x512xf32>,
    %c0_i32_12 = arith.constant 0 : i32
    %13 = arith.cmpi eq, %arg0, %c0_i32_12 : i32
    %14 = arith.extui %13 : i1 to i32
    %c0_i32_13 = arith.constant 0 : i32
    %15 = arith.cmpi ne, %14, %c0_i32_13 : i32
    scf.if %15 {
      %c0_14 = arith.constant 0 : index
      %c0_15 = arith.constant 0 : index
      %16 = vector.load %arg4[%c0_14, %c0_15] : memref<8x512xf32, #tpu.memory_space<vmem>>, vector<8x512xf32>
      %17 = vector.shape_cast %16 : vector<8x512xf32> to vector<1x8x512xf32>
      %cst = arith.constant dense<0.000000e+00> : vector<1xf32>
      %18 = vector.multi_reduction <add>, %17, %cst [1, 2] : vector<1x8x512xf32> to vector<1xf32>
      %19 = vector.shape_cast %18 : vector<1xf32> to vector<1x1x1xf32>
      %20 = vector.extract %19[0, 0, 0] : f32 from vector<1x1x1xf32>
      %c0_16 = arith.constant 0 : index
      %c0_17 = arith.constant 0 : index
      %21 = vector.load %arg5[%c0_16, %c0_17] : memref<8x512xf32, #tpu.memory_space<vmem>>, vector<8x512xf32>
      %22 = vector.shape_cast %21 : vector<8x512xf32> to vector<1x8x512xf32>
      %cst_18 = arith.constant dense<0.000000e+00> : vector<1xf32>
      %23 = vector.multi_reduction <add>, %22, %cst_18 [1, 2] : vector<1x8x512xf32> to vector<1xf32>
      %24 = vector.shape_cast %23 : vector<1xf32> to vector<1x1x1xf32>
      %25 = vector.extract %24[0, 0, 0] : f32 from vector<1x1x1xf32>
      %cst_19 = arith.constant 2.000000e+00 : f32
      %26 = arith.mulf %cst_19, %20 : f32
      %cst_20 = arith.constant 9.99999997E-7 : f32
      %27 = arith.addf %26, %cst_20 : f32
      %cst_21 = arith.constant 9.99999997E-7 : f32
      %28 = arith.addf %25, %cst_21 : f32
      %29 = arith.divf %27, %28 : f32
      %c0_22 = arith.constant 0 : index
      %c0_23 = arith.constant 0 : index
      %30 = memref.load %arg3[%c0_22, %c0_23] : memref<1x1xf32, #tpu.memory_space<smem>>
      memref.store %29, %arg3[%c0_22, %c0_23] : memref<1x1xf32, #tpu.memory_space<smem>>
    } else {
    }
    return
  }
  func.func @transform_0(%arg0: i32) -> (i32, i32) {
    %c0_i32 = arith.constant 0 : i32
    %c0_i32_0 = arith.constant 0 : i32
    return %arg0, %c0_i32 : i32, i32
  }
  func.func @transform_1(%arg0: i32) -> (i32, i32) {
    %c0_i32 = arith.constant 0 : i32
    %c0_i32_0 = arith.constant 0 : i32
    return %arg0, %c0_i32 : i32, i32
  }
  func.func @transform_2(%arg0: i32) -> (i32, i32) {
    %c0_i32 = arith.constant 0 : i32
    %c0_i32_0 = arith.constant 0 : i32
    %c0_i32_1 = arith.constant 0 : i32
    return %c0_i32, %c0_i32_0 : i32, i32
  }
}

</mosaic_0001>

<bundles_post_ra>
// kernel: tpu_custom_call.1
= control target key start
LH: loop header
LB: loop body
LE: loop exit
PB: predicated region body
PF: predicated region fallthrough
CT: control target
= control target key end

     0   :  { %7 = vsyncpa [#allocation5], 0  ;;  %s270_s0 = inlined_call_operand.hbm [shape: f32[8,512], index: 0, kind: input, shape index: {}]   ;;  %s271_s1 = inlined_call_operand.hbm [shape: f32[8,512], index: 1, kind: input, shape index: {}]   ;;  %s272_s2 = inlined_call_operand.hbm [shape: f32[1,1], index: 2, kind: output, shape index: {}]  }
   0x1   :  { %8 = vsyncpa [#allocation8], 0 }
   0x2   :  { %9 = vsyncpa [#allocation6], 0  ;;  %s15_s11 = sshll.u32 %s270_s0, 4  ;;  %s243_s12 = smov [#allocation4]   ;;  %s16_s11 = int_to_ptr.hbm [resolvable:$true] %s15_s11 }
   0x3   :  { %s17_s13 = sshll.u32 %s243_s12, 4  ;;  %s26_s16 = sshll.u32 %s271_s1, 4  ;;  %s18_s13 = int_to_ptr.vmem [resolvable:$true] %s17_s13  ;;  %s27_s16 = int_to_ptr.hbm [resolvable:$true] %s26_s16 }
   0x4   :  { %20 = dma.hbm_to_vmem [thread:$0]  %s16_s11, 512, %s18_s13, [#allocation5]  }
   0x5   :  { %s244_s17 = smov [#allocation7]  }
   0x6   :  { %s28_s18 = sshll.u32 %s244_s17, 4  ;;  %s29_s18 = int_to_ptr.vmem [resolvable:$true] %s28_s18 }
   0x7   :  { %31 = dma.hbm_to_vmem [thread:$0]  %s27_s16, 512, %s29_s18, [#allocation8]  }
   0x8   :  { %237 = dma.done.wait [#allocation5], 512  }
   0x9   :  { %238 = vsyncadd [#allocation5], 4294966784 }
   0xa   :  { %239 = dma.done.wait [#allocation8], 512  }
   0xb   :  { %240 = vsyncadd [#allocation8], 4294966784  ;;  %v52_v0 = vld [vmem:[#allocation4] sm:$0xff]  ;;  %v53_v1 = vld [vmem:[#allocation4 + $0x8] sm:$0xff]  ;;  %s154_s23 = sshll.u32 %s272_s2, 4  ;;  %s245_s27 = smov [#allocation9]   ;;  %s155_s23 = int_to_ptr.hbm [resolvable:$true] %s154_s23 }
   0xc   :  { %v54_v2 = vld [vmem:[#allocation4 + $0x10] sm:$0xff]  ;;  %v55_v3 = vld [vmem:[#allocation4 + $0x18] sm:$0xff]  ;;  %v56_v4 = vld [vmem:[#allocation7] sm:$0xff] }
   0xd   :  { %v57_v5 = vld [vmem:[#allocation7 + $0x8] sm:$0xff]  ;;  %v58_v6 = vld [vmem:[#allocation7 + $0x10] sm:$0xff]  ;;  %v59_v7 = vld [vmem:[#allocation7 + $0x18] sm:$0xff]  ;;  %v64_v8 = vmul.f32 %v56_v4, %v52_v0  ;;  %v80_v10 = vadd.f32 %v56_v4, %v52_v0 }
   0xe   :  { %v65_v9 = vmul.f32 %v57_v5, %v53_v1  ;;  %v81_v11 = vadd.f32 %v57_v5, %v53_v1  ;;  %v66_v12 = vmul.f32 %v58_v6, %v54_v2  ;;  %v67_v13 = vmul.f32 %v59_v7, %v55_v3 }
   0xf   :  { %v82_v16 = vadd.f32 %v58_v6, %v54_v2  ;;  %v83_v19 = vadd.f32 %v59_v7, %v55_v3 }
  0x10   :  { %v99_v14 = vadd.f32 %v65_v9, %v64_v8  ;;  %v115_v17 = vadd.f32 %v81_v11, %v80_v10 }
  0x12   :  { %v100_v15 = vadd.f32 %v99_v14, %v66_v12  ;;  %v116_v20 = vadd.f32 %v115_v17, %v82_v16 }
  0x14   :  { %v101_v18 = vadd.f32 %v100_v15, %v67_v13  ;;  %v117_v21 = vadd.f32 %v116_v20, %v83_v19 }
  0x16   :  { %102 = vadd.xlane.f32.xlu0 %v101_v18 }
  0x1e   :  { %118 = vadd.xlane.f32.xlu0 %v117_v21 }
  0x89   :  { %v103_v22 = vpop.xlane.xlu0 %102 }
  0x8a   :  { %v104_v23 = vrot.slane %v103_v22, 4 }
  0x8c   :  { %v105_v24 = vadd.f32 %v104_v23, %v103_v22 }
  0x8e   :  { %v106_v25 = vrot.slane %v105_v24, 2 }
  0x90   :  { %v107_v26 = vadd.f32 %v106_v25, %v105_v24 }
  0x91   :  { %v119_v27 = vpop.xlane.xlu0 %118 }
  0x92   :  { %v120_v28 = vrot.slane %v119_v27, 4  ;;  %v108_v29 = vrot.slane %v107_v26, 1 }
  0x94   :  { %v121_v30 = vadd.f32 %v120_v28, %v119_v27  ;;  %v109_v31 = vadd.f32 %v108_v29, %v107_v26 }
  0x96   :  { %v122_v32 = vrot.slane %v121_v30, 2  ;;  %166 = vpush %v109_v31 }
  0x98   :  { %v123_v33 = vadd.f32 %v122_v32, %v121_v30 }
  0x9a   :  { %v124_v34 = vrot.slane %v123_v33, 1 }
  0x9c   :  { %v125_v35 = vadd.f32 %v124_v34, %v123_v33 }
  0x9e   :  { %168 = vpush %v125_v35 }
  0xc7   :  { %s167_s0 = spop %166 }
  0xc8   :  { %s127_s20 = smul.f32 2.0, %s167_s0 }
  0xca   :  { %s128_s24 = sadd.f32 1e-06, %s127_s20 }
  0xcf   :  { %s169_s1 = spop %168 }
  0xd0   :  { %s129_s19 = sadd.f32 1e-06, %s169_s1 }
  0xd2   :  { %v130_v36 = vstv %s129_s19 }
  0xd3   :  { %175 = vrcp.f32 %v130_v36  ;;  %v142_v40 = vand.u32 2147483648, %v130_v36  ;;  %v140_v42 = vand.u32 2147483647, %v130_v36  ;;  %vm136_vm1 = vweird.f32 %v130_v36 }
  0xd5   :  { %v143_v44 = vor.u32 1.1754944e-38, %v142_v40  ;;  %vm141_vm3 = vcmp.eq.f32.partialorder %v140_v42, 8.507059e+37 }
  0xd9   :  { %v176_v37 = vpop.eup %175 }
  0xda   :  { %v132_v38 = vmul.f32 %v176_v37, %v130_v36  ;;  %vm137_vm0 = vweird.f32 %v176_v37 }
  0xdb   :  { %vm138_vm2 = vmor %vm136_vm1, %vm137_vm0 }
  0xdc   :  { %v133_v39 = vsub.f32 1.0, %v132_v38 }
  0xde   :  { %v134_v41 = vmul.f32 %v176_v37, %v133_v39 }
  0xe0   :  { %v135_v43 = vadd.f32 %v176_v37, %v134_v41 }
  0xe2   :  { %v139_v45 = vsel %vm138_vm2, %v176_v37, %v135_v43 }
  0xe3   :  { %v144_v46 = vsel %vm141_vm3, %v143_v44, %v139_v45 }
  0xe4   :  { %170 = vpush %v144_v46 }
 0x115   :  { %s171_s25 = spop %170 }
 0x116   :  { %s146_s26 = smul.f32 %s171_s25, %s128_s24 }
 0x118   :  { %148 = sst [smem:[#allocation9]] %s146_s26 }
 0x119   :  { %157 = dma.smem_to_hbm %s245_s27, 16, %s155_s23, [#allocation6]  }
 0x11a   :  { %241 = dma.done.wait [#allocation6], 16  }
 0x11b   :  { %242 = vsyncadd [#allocation6], 4294967280 }
 0x11c   :  { %162 = sfence }
 0x11d   :  { %163 = vsyncpa [#allocation5], 1 }
 0x11e   :  { %164 = vsyncpa [#allocation8], 1 }
 0x11f   :  { %165 = vsyncpa [#allocation6], 1 }

</bundles_post_ra>
